<compile_context>
chip_gen: v7x
topology: tpu7x:2x2x1
jax: 0.10.0
libtpu: 0.0.40
codegen_flags: <defaults>
</compile_context>

<pallas_src>
import math
import functools

import jax
import jax.numpy as jnp
from jax.experimental import pallas as pl
from jax.experimental.pallas import tpu as pltpu  # noqa: F401  (kept for parity with template)

SQRT2 = math.sqrt(2.0)

# ----- small stand-in config for StyleGAN2 (@1024 in the checkpoint; tiny here) -----
STYLE_DIM = 32               # style_dims
N_MLP = 2                    # mapping layers
IMAGE_SIZE = 16              # image_size
CHANNELS = {4: 32, 8: 16, 16: 8}
LOG_SIZE = int(math.log2(IMAGE_SIZE))
N_LATENT = LOG_SIZE * 2 - 2                    # 6 (single-latent path broadcasts anyway)
NUM_NOISE_LAYERS = (LOG_SIZE - 2) * 2 + 1      # 5


# ============================ Pallas kernels ============================

def _mapping_kernel(*refs, n_layers):
    """PixelNorm + n_layers x (EqualLinear + fused leaky-relu), fused into one kernel.
    refs = (z, wT_0, b_0, wT_1, b_1, ..., out); wT/b are pre-scaled at init."""
    z_ref, o_ref = refs[0], refs[-1]
    x = z_ref[...]
    x = x * jax.lax.rsqrt(jnp.mean(x * x, axis=1, keepdims=True) + 1e-8)   # PixelNorm
    for l in range(n_layers):
        wT = refs[1 + 2 * l][...]
        b = refs[2 + 2 * l][...]
        y = jnp.dot(x, wT, preferred_element_type=jnp.float32) + b
        x = jnp.where(y >= 0.0, y, 0.2 * y) * SQRT2                        # fused_leaky_relu
    o_ref[...] = x


def _modconv_kernel(*refs, batch, demodulate, fuse_act, has_cbias, add_skip, noise_w):
    """Shared-weight modulated conv as (Cout, CKK) @ (CKK, HW) per sample (lane-dense
    output), with optional demod / noise+bias+leaky-relu / conv-bias / skip-add fused.

    ref order: patches (B,CKK,HW), wmat (Cout,CKK), [demod (B,Cout,1)],
               [noise (B,1,HW), act_bias (Cout,1)], [conv_bias (Cout,1)],
               [skip (B,Cout,HW)], out (B,Cout,HW)."""
    it = iter(refs)
    patches_ref = next(it)
    w_ref = next(it)
    demod_ref = next(it) if demodulate else None
    noise_ref = next(it) if fuse_act else None
    abias_ref = next(it) if fuse_act else None
    cbias_ref = next(it) if has_cbias else None
    skip_ref = next(it) if add_skip else None
    o_ref = next(it)

    w = w_ref[...]                                           # loaded once, shared over batch
    for b in range(batch):                                   # small static batch, unrolled
        out = jnp.dot(w, patches_ref[b], preferred_element_type=jnp.float32)
        if demodulate:
            out = out * demod_ref[b]                         # (Cout,1) lane-broadcast
        if has_cbias:
            out = out + cbias_ref[...]                       # ToRGB bias
        if fuse_act:
            out = out + noise_w * noise_ref[b] + abias_ref[...]   # NoiseInjection + bias
            out = jnp.where(out >= 0.0, out, 0.2 * out) * SQRT2   # FusedLeakyReLU
        if add_skip:
            out = out + skip_ref[b]                          # ToRGB skip connection
        o_ref[b] = out


def _blur_core(x):
    """Separable [1,3,3,1] FIR (valid), gain=4 folded in; x: (B,C,Hp,Wp) -> (B,C,Hp-3,Wp-3)."""
    t = (1.0, 3.0, 3.0, 1.0)
    B, C, Hp, Wp = x.shape
    Ho, Wo = Hp - 3, Wp - 3
    acc = t[0] * x[:, :, 0:Ho, :]
    for i in range(1, 4):
        acc = acc + t[i] * x[:, :, i:i + Ho, :]
    out = t[0] * acc[:, :, :, 0:Wo]
    for j in range(1, 4):
        out = out + t[j] * acc[:, :, :, j:j + Wo]
    return out * (4.0 / 64.0)                                # * factor**2 / sum(k)^2


def _blur_kernel(x_ref, o_ref):
    o_ref[...] = _blur_core(x_ref[...])


def _blur_epilogue_kernel(x_ref, n_ref, b_ref, o_ref, *, noise_w):
    """Blur after the upsample conv, fused with noise + bias + leaky-relu*sqrt(2)."""
    y = _blur_core(x_ref[...]) + noise_w * n_ref[...] + b_ref[...]
    o_ref[...] = jnp.where(y >= 0.0, y, 0.2 * y) * SQRT2


# ============================ kernel wrappers ============================

def mapping_network(z, mlp_prep):
    args = [z]
    for (wT, b) in mlp_prep:
        args += [wT, b]
    kern = functools.partial(_mapping_kernel, n_layers=len(mlp_prep))
    out_dim = mlp_prep[-1][0].shape[1]
    return pl.pallas_call(
        kern, out_shape=jax.ShapeDtypeStruct((z.shape[0], out_dim), jnp.float32),
    )(*args)


def blur_only(xpad, out_h, out_w):
    B, C = xpad.shape[:2]
    return pl.pallas_call(
        _blur_kernel, out_shape=jax.ShapeDtypeStruct((B, C, out_h, out_w), jnp.float32),
    )(xpad)


def blur_noise_act(xpad, noise, bias, noise_w, out_h, out_w):
    B, C = xpad.shape[:2]
    kern = functools.partial(_blur_epilogue_kernel, noise_w=float(noise_w))
    return pl.pallas_call(
        kern, out_shape=jax.ShapeDtypeStruct((B, C, out_h, out_w), jnp.float32),
    )(xpad, noise, bias.reshape(1, C, 1, 1))


# ============================ glue helpers ============================

def im2col_flat(xpad, K):
    """(B, C, Hp, Wp) -> (B, C*K*K, Ho*Wo); CKK index = cin*K*K + i*K + j."""
    B, C, Hp, Wp = xpad.shape
    Ho, Wo = Hp - K + 1, Wp - K + 1
    cols = [xpad[:, :, i:i + Ho, j:j + Wo] for i in range(K) for j in range(K)]
    patches = jnp.stack(cols, axis=2)                        # (B, C, K*K, Ho, Wo)
    return patches.reshape(B, C * K * K, Ho * Wo), Ho, Wo


def zero_insert(x, up):
    B, C, H, W = x.shape
    out = jnp.zeros((B, C, H, up, W, up), x.dtype)
    out = out.at[:, :, :, 0, :, 0].set(x)
    return out.reshape(B, C, H * up, W * up)


# ============================ StyleGAN2 building blocks ============================

def modulated_conv(x, w_latent, lp, *, noise=None, act_bias=None, conv_bias=None, skip=None):
    """ModulatedConv2d with activation-side modulation, shared weights, fused epilogue.
    x: (B, Cin, H, W) -> (B, Cout, Ho, Wo)."""
    B, Cin, H, W = x.shape
    K, upsample, demod = lp['K'], lp['upsample'], lp['demodulate']
    Cout = lp['wmat'].shape[0]

    # style = modulation(w): EqualLinear(style_dim -> Cin, bias_init=1), no activation.
    style = jnp.dot(w_latent, lp['mod_wT']) + lp['mod_b']              # (B, Cin)
    xm = x * style[:, :, None, None]                                   # modulate activations

    if upsample:
        # conv_transpose2d(stride=2) == conv over zero-inserted input with flipped,
        # (in,out)-swapped weights (flip folded into lp['wmat'] at init).
        xu = zero_insert(xm, 2)[:, :, : 2 * H - 1, : 2 * W - 1]
        xp = jnp.pad(xu, ((0, 0), (0, 0), (K - 1, K - 1), (K - 1, K - 1)))
    else:
        p = K // 2
        xp = jnp.pad(xm, ((0, 0), (0, 0), (p, p), (p, p))) if p else xm

    patches, Ho, Wo = im2col_flat(xp, K)
    patches = patches.astype(lp['wmat'].dtype)                         # bf16 for 3x3 convs

    inputs = [patches, lp['wmat']]
    if demod:
        # demod[b, cout] = rsqrt(sum_{cin,k,k} (scale*w*style)^2 + eps)
        d = jax.lax.rsqrt(jnp.dot(style * style, lp['wsq']) + 1e-8)    # (B, Cout)
        inputs.append(d[:, :, None])
    fuse_act = noise is not None
    if fuse_act:
        inputs.append(noise.reshape(B, 1, Ho * Wo))
        inputs.append(act_bias.reshape(Cout, 1))
    has_cbias = conv_bias is not None
    if has_cbias:
        inputs.append(conv_bias.reshape(Cout, 1))
    add_skip = skip is not None
    if add_skip:
        inputs.append(skip.reshape(B, Cout, Ho * Wo))

    kern = functools.partial(
        _modconv_kernel, batch=B, demodulate=demod, fuse_act=fuse_act,
        has_cbias=has_cbias, add_skip=add_skip, noise_w=float(lp.get('noise_w', 0.0)))
    out = pl.pallas_call(
        kern, out_shape=jax.ShapeDtypeStruct((B, Cout, Ho * Wo), jnp.float32),
    )(*inputs)
    return out.reshape(B, Cout, Ho, Wo)


def styled_conv(x, w_latent, lp, noise_key):
    """StyledConv: ModulatedConv2d (+Blur if upsample) + NoiseInjection + FusedLeakyReLU."""
    B = x.shape[0]
    if lp['upsample']:
        pre = modulated_conv(x, w_latent, lp)                          # (B, Cout, 2H+1, 2W+1)
        pre = jnp.pad(pre, ((0, 0), (0, 0), (1, 1), (1, 1)))           # Blur pad=(1,1)
        Ho, Wo = 2 * x.shape[2], 2 * x.shape[3]
        noise = jax.random.normal(noise_key, (B, 1, Ho, Wo), jnp.float32)  # randomize_noise
        return blur_noise_act(pre, noise, lp['act_bias'], lp['noise_w'], Ho, Wo)
    H, W = x.shape[2], x.shape[3]
    noise = jax.random.normal(noise_key, (B, 1, H, W), jnp.float32)
    return modulated_conv(x, w_latent, lp, noise=noise, act_bias=lp['act_bias'])


def to_rgb(x, w_latent, lp, skip=None):
    """ToRGB: 1x1 modulated conv (no demod) + bias, plus Upsample(blur)-ed skip."""
    skip_up = None
    if skip is not None:
        B, C, H, W = skip.shape
        sk = zero_insert(skip, 2)                                      # upfirdn up=2
        sk = jnp.pad(sk, ((0, 0), (0, 0), (2, 1), (2, 1)))             # pad=(2,1)
        skip_up = blur_only(sk, 2 * H, 2 * W)
    return modulated_conv(x, w_latent, lp, conv_bias=lp['bias'], skip=skip_up)


def generator_forward(params, styles, noise_key, *, truncation=1.0,
                      truncation_latent=None, input_is_latent=False):
    if not input_is_latent:
        styles = [mapping_network(s, params['mlp']) for s in styles]
    if truncation < 1:
        styles = [truncation_latent + truncation * (s - truncation_latent) for s in styles]
    latent = styles[0]                      # single-style path: same W broadcast to all layers
    B = latent.shape[0]
    nkeys = jax.random.split(noise_key, NUM_NOISE_LAYERS)

    out = jnp.repeat(params['const'], B, axis=0)                       # ConstantInput
    out = styled_conv(out, latent, params['conv1'], nkeys[0])
    skip = to_rgb(out, latent, params['to_rgb1'])

    n = 1
    for (conv_up_p, conv_p, rgb_p) in params['blocks']:
        out = styled_conv(out, latent, conv_up_p, nkeys[n])
        out = styled_conv(out, latent, conv_p, nkeys[n + 1])
        skip = to_rgb(out, latent, rgb_p, skip)
        n += 2
    return skip                                                        # image (B, 3, H, W)


# ============================ parameter init (synthetic, deterministic) ============================

def init_params(key):
    ki = iter(jax.random.split(key, 64))

    def modconv_params(in_c, out_c, k, *, upsample, demodulate):
        w = jax.random.normal(next(ki), (out_c, in_c, k, k), jnp.float32)
        scale = 1.0 / math.sqrt(in_c * k * k)
        w_eff = w[:, :, ::-1, ::-1] if upsample else w                 # flipped for transposed conv
        mm_dtype = jnp.bfloat16 if k > 1 else jnp.float32              # bf16 MXU for 3x3 convs
        return {
            'K': k, 'upsample': upsample, 'demodulate': demodulate,
            'wmat': (scale * w_eff).reshape(out_c, in_c * k * k).astype(mm_dtype),
            'wsq': (scale ** 2) * jnp.sum(w * w, axis=(2, 3)).T,       # (in_c, out_c), f32
            'mod_wT': jax.random.normal(next(ki), (in_c, STYLE_DIM), jnp.float32).T
                      * (1.0 / math.sqrt(STYLE_DIM)),
            'mod_b': jnp.ones((in_c,), jnp.float32),                   # bias_init=1
        }

    def styled_conv_params(in_c, out_c, *, upsample):
        p = modconv_params(in_c, out_c, 3, upsample=upsample, demodulate=True)
        # torch inits NoiseInjection.weight=0 / FusedLeakyReLU.bias=0; use small nonzero
        # deterministic values so those fused code paths are actually exercised.
        p['noise_w'] = 0.05
        p['act_bias'] = 0.01 * jax.random.normal(next(ki), (out_c,), jnp.float32)
        return p

    def to_rgb_params(in_c):
        p = modconv_params(in_c, 3, 1, upsample=False, demodulate=False)
        p['bias'] = 0.01 * jax.random.normal(next(ki), (3,), jnp.float32)
        return p

    params = {}
    # mapping: EqualLinear(lr_mul=0.01): weight=randn/lr_mul, bias=0; pre-fold scale/lr_mul.
    lr_mul = 0.01
    lin_scale = (1.0 / math.sqrt(STYLE_DIM)) * lr_mul
    mlp = []
    for _ in range(N_MLP):
        w = jax.random.normal(next(ki), (STYLE_DIM, STYLE_DIM), jnp.float32) / lr_mul
        b = jnp.zeros((STYLE_DIM,), jnp.float32)
        mlp.append((w.T * lin_scale, (b * lr_mul).reshape(1, STYLE_DIM)))
    params['mlp'] = mlp

    params['const'] = jax.random.normal(next(ki), (1, CHANNELS[4], 4, 4), jnp.float32)
    params['conv1'] = styled_conv_params(CHANNELS[4], CHANNELS[4], upsample=False)
    params['to_rgb1'] = to_rgb_params(CHANNELS[4])
    params['blocks'] = []
    in_c = CHANNELS[4]
    for res in (8, 16):
        out_c = CHANNELS[res]
        params['blocks'].append((
            styled_conv_params(in_c, out_c, upsample=True),    # StyledConv upsample=True
            styled_conv_params(out_c, out_c, upsample=False),  # StyledConv upsample=False
            to_rgb_params(out_c),                              # ToRGB (upsamples skip)
        ))
        in_c = out_c
    return params


# ============================ NADAGenerator wrapper ============================

class NADAGeneratorPallas:
    """Pallas port of NADAGenerator.forward: mapping -> truncation (with mean_latent)
    -> StyleGAN2 synthesis."""

    def __init__(self, param_key, mean_key):
        self.params = init_params(param_key)
        # NADAGenerator.__init__: mean_latent(4096); use 64 samples here (synthetic weights).
        z = jax.random.normal(mean_key, (64, STYLE_DIM), jnp.float32)
        w = mapping_network(z, self.params['mlp'])
        self.mean_latent = jnp.mean(w, axis=0, keepdims=True)

    def __call__(self, styles, noise_key, truncation=1.0, input_is_latent=False):
        return generator_forward(self.params, styles, noise_key,
                                 truncation=truncation,
                                 truncation_latent=self.mean_latent,
                                 input_is_latent=input_is_latent)


if __name__ == "__main__":
    key = jax.random.PRNGKey(0)
    k_params, k_mean, k_style, k_noise = jax.random.split(key, 4)

    gen = NADAGeneratorPallas(k_params, k_mean)
    z = jax.random.normal(k_style, (2, STYLE_DIM), jnp.float32)        # styles = [z]

    img = gen([z], k_noise, truncation=0.7, input_is_latent=False)
    img = jax.block_until_ready(img)

    assert img.shape == (2, 3, IMAGE_SIZE, IMAGE_SIZE), img.shape
    assert bool(jnp.all(jnp.isfinite(img)))
    print("KERNEL_OK")
</pallas_src>

<mosaic_0001>
module attributes {stable_mosaic.version = 11 : i64} {
  func.func @_mapping_kernel(%arg0: memref<64x32xf32, #tpu.memory_space<vmem>>, %arg1: memref<32x32xf32, #tpu.memory_space<vmem>>, %arg2: memref<1x32xf32, #tpu.memory_space<vmem>>, %arg3: memref<32x32xf32, #tpu.memory_space<vmem>>, %arg4: memref<1x32xf32, #tpu.memory_space<vmem>>, %arg5: memref<64x32xf32, #tpu.memory_space<vmem>>) attributes {dimension_semantics = [], scalar_prefetch = 0 : i64, scratch_operands = 0 : i64, tpu.core_type = #tpu.core_type<tc>} {
    %c0 = arith.constant 0 : index
    %c0_0 = arith.constant 0 : index
    %0 = vector.load %arg0[%c0, %c0_0] : memref<64x32xf32, #tpu.memory_space<vmem>>, vector<64x32xf32>
    %1 = arith.mulf %0, %0 : vector<64x32xf32>
    %cst = arith.constant dense<0.000000e+00> : vector<64xf32>
    %2 = vector.multi_reduction <add>, %1, %cst [1] : vector<64x32xf32> to vector<64xf32>
    %3 = vector.shape_cast %2 : vector<64xf32> to vector<64x1xf32>
    %cst_1 = arith.constant 3.200000e+01 : f32
    %4 = vector.broadcast %cst_1 : f32 to vector<64x1xf32>
    %5 = arith.divf %3, %4 : vector<64x1xf32>
    %cst_2 = arith.constant 9.99999993E-9 : f32
    %6 = vector.broadcast %cst_2 : f32 to vector<64x1xf32>
    %7 = arith.addf %5, %6 : vector<64x1xf32>
    %8 = math.rsqrt %7 : vector<64x1xf32>
    %9 = vector.broadcast %8 : vector<64x1xf32> to vector<64x32xf32>
    %10 = arith.mulf %0, %9 : vector<64x32xf32>
    %c0_3 = arith.constant 0 : index
    %c0_4 = arith.constant 0 : index
    %11 = vector.load %arg1[%c0_3, %c0_4] : memref<32x32xf32, #tpu.memory_space<vmem>>, vector<32x32xf32>
    %c0_5 = arith.constant 0 : index
    %c0_6 = arith.constant 0 : index
    %12 = vector.load %arg2[%c0_5, %c0_6] : memref<1x32xf32, #tpu.memory_space<vmem>>, vector<1x32xf32>
    %cst_7 = arith.constant dense<0.000000e+00> : vector<64x32xf32>
    %13 = tpu.matmul %10, %11, %cst_7 {dimension_numbers = #tpu.dot_dimension_numbers<[1], [0], [0], [1], [0, 0, 1, 1], [], []>} : vector<64x32xf32>, vector<32x32xf32>, vector<64x32xf32> -> vector<64x32xf32>
    %14 = vector.broadcast %12 : vector<1x32xf32> to vector<64x32xf32>
    %15 = arith.addf %13, %14 : vector<64x32xf32>
    %cst_8 = arith.constant 0.000000e+00 : f32
    %16 = vector.broadcast %cst_8 : f32 to vector<64x32xf32>
    %17 = arith.cmpf oge, %15, %16 : vector<64x32xf32>
    %cst_9 = arith.constant 2.000000e-01 : f32
    %18 = vector.broadcast %cst_9 : f32 to vector<64x32xf32>
    %19 = arith.mulf %18, %15 : vector<64x32xf32>
    %20 = arith.select %17, %15, %19 : vector<64x32xi1>, vector<64x32xf32>
    %cst_10 = arith.constant 1.41421354 : f32
    %21 = vector.broadcast %cst_10 : f32 to vector<64x32xf32>
    %22 = arith.mulf %20, %21 : vector<64x32xf32>
    %c0_11 = arith.constant 0 : index
    %c0_12 = arith.constant 0 : index
    %23 = vector.load %arg3[%c0_11, %c0_12] : memref<32x32xf32, #tpu.memory_space<vmem>>, vector<32x32xf32>
    %c0_13 = arith.constant 0 : index
    %c0_14 = arith.constant 0 : index
    %24 = vector.load %arg4[%c0_13, %c0_14] : memref<1x32xf32, #tpu.memory_space<vmem>>, vector<1x32xf32>
    %cst_15 = arith.constant dense<0.000000e+00> : vector<64x32xf32>
    %25 = tpu.matmul %22, %23, %cst_15 {dimension_numbers = #tpu.dot_dimension_numbers<[1], [0], [0], [1], [0, 0, 1, 1], [], []>} : vector<64x32xf32>, vector<32x32xf32>, vector<64x32xf32> -> vector<64x32xf32>
    %26 = vector.broadcast %24 : vector<1x32xf32> to vector<64x32xf32>
    %27 = arith.addf %25, %26 : vector<64x32xf32>
    %cst_16 = arith.constant 0.000000e+00 : f32
    %28 = vector.broadcast %cst_16 : f32 to vector<64x32xf32>
    %29 = arith.cmpf oge, %27, %28 : vector<64x32xf32>
    %cst_17 = arith.constant 2.000000e-01 : f32
    %30 = vector.broadcast %cst_17 : f32 to vector<64x32xf32>
    %31 = arith.mulf %30, %27 : vector<64x32xf32>
    %32 = arith.select %29, %27, %31 : vector<64x32xi1>, vector<64x32xf32>
    %cst_18 = arith.constant 1.41421354 : f32
    %33 = vector.broadcast %cst_18 : f32 to vector<64x32xf32>
    %34 = arith.mulf %32, %33 : vector<64x32xf32>
    %c0_19 = arith.constant 0 : index
    %c0_20 = arith.constant 0 : index
    %35 = vector.load %arg5[%c0_19, %c0_20] : memref<64x32xf32, #tpu.memory_space<vmem>>, vector<64x32xf32>
    tpu.vector_store %arg5[%c0_19, %c0_20], %34 {strides = array<i32>} : memref<64x32xf32, #tpu.memory_space<vmem>>, vector<64x32xf32>,
    return
  }
}

</mosaic_0001>

<bundles_post_ra>
// kernel: tpu_custom_call.1
= control target key start
LH: loop header
LB: loop body
LE: loop exit
PB: predicated region body
PF: predicated region fallthrough
CT: control target
= control target key end

     0   :  { %vm36_vm0 = vcmask 261120   ;;  %s744_s0 = inlined_call_operand.vmem [shape: f32[64,32], index: 0, kind: input, shape index: {}]   ;;  %s745_s1 = inlined_call_operand.vmem [shape: f32[32,32], index: 1, kind: input, shape index: {}]   ;;  %s746_s3 = inlined_call_operand.vmem [shape: f32[32,32], index: 3, kind: input, shape index: {}]   ;;  %s747_s2 = inlined_call_operand.vmem [shape: f32[1,32], index: 2, kind: input, shape index: {}]   ;;  %s748_s4 = inlined_call_operand.vmem [shape: f32[1,32], index: 4, kind: input, shape index: {}]   ;;  %s749_s5 = inlined_call_operand.vmem [shape: f32[64,32], index: 5, kind: output, shape index: {}]  }
   0x1   :  { %v597_v0 = vld [vmem:[%s744_s0] sm:$0xff]  ;;  %v602_v1 = vld [vmem:[%s744_s0 + $0x10] sm:$0xff]  ;;  %v607_v2 = vld [vmem:[%s744_s0 + $0x8] sm:$0xff] }
   0x2   :  { %v28_v3 = vmul.f32 %v597_v0, %v597_v0  ;;  %v30_v4 = vmul.f32 %v602_v1, %v602_v1  ;;  %v29_v5 = vmul.f32 %v607_v2, %v607_v2  ;;  %v618_v6 = vld [vmem:[%s744_s0 + $0x18] sm:$0xff]  ;;  %v625_v8 = vld [vmem:[%s744_s0 + $0x20] sm:$0xff]  ;;  %v630_v9 = vld [vmem:[%s744_s0 + $0x28] sm:$0xff] }
   0x3   :  { %v31_v7 = vmul.f32 %v618_v6, %v618_v6  ;;  %v32_v14 = vmul.f32 %v625_v8, %v625_v8  ;;  %v33_v15 = vmul.f32 %v630_v9, %v630_v9  ;;  %v643_v16 = vld [vmem:[%s744_s0 + $0x30] sm:$0xff]  ;;  %v648_v17 = vld [vmem:[%s744_s0 + $0x38] sm:$0xff]  ;;  %v94_v24 = vld [vmem:[%s745_s1] sm:$0xff] }
   0x4   :  { %v37_v10 = vsel %vm36_vm0, %v28_v3, 0.0  ;;  %v43_v11 = vsel %vm36_vm0, %v30_v4, 0.0  ;;  %v40_v12 = vsel %vm36_vm0, %v29_v5, 0.0  ;;  %v34_v20 = vmul.f32 %v643_v16, %v643_v16  ;;  %v95_v25 = vld [vmem:[%s745_s1 + $0x8] sm:$0xff]  ;;  %v96_v27 = vld [vmem:[%s745_s1 + $0x10] sm:$0xff]  ;;  %v97_v28 = vld [vmem:[%s745_s1 + $0x18] sm:$0xff] }
   0x5   :  { %38 = vadd.xlane.f32.xlu0 %v37_v10  ;;  %44 = vadd.xlane.f32.xlu1 %v43_v11  ;;  %v46_v13 = vsel %vm36_vm0, %v31_v7, 0.0  ;;  %v49_v18 = vsel %vm36_vm0, %v32_v14, 0.0  ;;  %v52_v19 = vsel %vm36_vm0, %v33_v15, 0.0  ;;  %v35_v21 = vmul.f32 %v648_v17, %v648_v17  ;;  %v267_v7 = vld [vmem:[%s746_s3 + $0x8] sm:$0xff]  ;;  %v269_v10 = vld [vmem:[%s746_s3 + $0x18] sm:$0xff] }
   0x6   :  { %v55_v22 = vsel %vm36_vm0, %v34_v20, 0.0  ;;  %v532_v26 = vpack.c.bf16 %v95_v25, %v94_v24  ;;  %v536_v29 = vpack.c.bf16 %v97_v28, %v96_v27 }
   0x7   :  { %v58_v23 = vsel %vm36_vm0, %v35_v21, 0.0 }
   0x8   :  { %533 = vmatprep.subr.bf16.mxu0 %v532_v26 }
   0x9   :  { %41 = vadd.xlane.f32.xlu0 %v40_v12  ;;  %47 = vadd.xlane.f32.xlu1 %v46_v13  ;;  %v450_v12 = vld [vmem:[%s747_s2] ss:$0 sm:$0xff] }
   0xa   :  { %535 = vmatpush3.bf16.msra.mxu0 %v532_v26 }
   0xb   :  { %537 = vmatprep.subr.bf16.mxu0 %v536_v29 }
   0xd   :  { %50 = vadd.xlane.f32.xlu0 %v49_v18  ;;  %53 = vadd.xlane.f32.xlu1 %v52_v19 }
   0xe   :  { %539 = vmatpush3.bf16.msra.mxu0 %v536_v29 }
  0x11   :  { %56 = vadd.xlane.f32.xlu0 %v55_v22  ;;  %59 = vadd.xlane.f32.xlu1 %v58_v23 }
  0x92   :  { %v39_v30 = vpop.xlane.xlu0 %38  ;;  %v45_v31 = vpop.xlane.xlu1 %44 }
  0x93   :  { %v62_v32 = vmul.f32 0.03125, %v39_v30  ;;  %v64_v33 = vmul.f32 0.03125, %v45_v31 }
  0x95   :  { %v70_v34 = vadd.f32 1e-08, %v62_v32  ;;  %v72_v35 = vadd.f32 1e-08, %v64_v33 }
  0x96   :  { %v42_v36 = vpop.xlane.xlu0 %41  ;;  %v48_v37 = vpop.xlane.xlu1 %47 }
  0x97   :  { %548 = vrsqrt.f32 %v70_v34  ;;  %v63_v38 = vmul.f32 0.03125, %v42_v36  ;;  %v65_v39 = vmul.f32 0.03125, %v48_v37 }
  0x98   :  { %550 = vrsqrt.f32 %v72_v35 }
  0x99   :  { %v71_v40 = vadd.f32 1e-08, %v63_v38  ;;  %v73_v41 = vadd.f32 1e-08, %v65_v39 }
  0x9a   :  { %v51_v42 = vpop.xlane.xlu0 %50  ;;  %v54_v43 = vpop.xlane.xlu1 %53 }
  0x9b   :  { %552 = vrsqrt.f32 %v71_v40  ;;  %v66_v44 = vmul.f32 0.03125, %v51_v42  ;;  %v67_v45 = vmul.f32 0.03125, %v54_v43 }
  0x9c   :  { %554 = vrsqrt.f32 %v73_v41 }
  0x9d   :  { %v74_v46 = vadd.f32 1e-08, %v66_v44  ;;  %v75_v47 = vadd.f32 1e-08, %v67_v45 }
  0x9e   :  { %v57_v48 = vpop.xlane.xlu0 %56  ;;  %v60_v49 = vpop.xlane.xlu1 %59 }
  0x9f   :  { %556 = vrsqrt.f32 %v74_v46  ;;  %v68_v50 = vmul.f32 0.03125, %v57_v48  ;;  %v69_v51 = vmul.f32 0.03125, %v60_v49 }
  0xa0   :  { %558 = vrsqrt.f32 %v75_v47 }
  0xa1   :  { %v549_v52 = vpop.eup %548  ;;  %v76_v53 = vadd.f32 1e-08, %v68_v50  ;;  %v77_v54 = vadd.f32 1e-08, %v69_v51 }
  0xa2   :  { %v551_v55 = vpop.eup %550  ;;  %v86_v56 = vmul.f32 %v549_v52, %v597_v0 }
  0xa3   :  { %560 = vrsqrt.f32 %v76_v53  ;;  %v88_v58 = vmul.f32 %v551_v55, %v602_v1  ;;  %v459_v53 = vld [vmem:[%s748_s4] ss:$0 sm:$0xff] }
  0xa4   :  { %562 = vrsqrt.f32 %v77_v54  ;;  %500 = vmatprep.mubr.msk.f32.mxu0 %vm36_vm0, %v86_v56 }
  0xa5   :  { %v553_v57 = vpop.eup %552 }
  0xa6   :  { %v555_v59 = vpop.eup %554  ;;  %v87_v60 = vmul.f32 %v553_v57, %v607_v2 }
  0xa7   :  { %v89_v61 = vmul.f32 %v555_v59, %v618_v6  ;;  %v266_v6 = vld [vmem:[%s746_s3] sm:$0xff] }
  0xa8   :  { %501 = vmatmul.mubr.msk.f32.vlgmr.msra.gmra.mrb[0].mxu0 %vm36_vm0, %v87_v60 }
  0xa9   :  { %v557_v62 = vpop.eup %556  ;;  %503 = vmatprep.mubr.msk.f32.mxu0 %vm36_vm0, %v88_v58 }
  0xaa   :  { %v559_v63 = vpop.eup %558  ;;  %v90_v0 = vmul.f32 %v557_v62, %v625_v8  ;;  %v540_v8 = vpack.c.bf16 %v267_v7, %v266_v6 }
  0xab   :  { %v91_v3 = vmul.f32 %v559_v63, %v630_v9  ;;  %v268_v9 = vld [vmem:[%s746_s3 + $0x10] sm:$0xff] }
  0xac   :  { %504 = vmatmul.mubr.msk.f32.gmra.mrb[2].mxu0 %vm36_vm0, %v89_v61  ;;  %541 = vmatprep.subr.bf16.mxu1 %v540_v8  ;;  %v544_v11 = vpack.c.bf16 %v269_v10, %v268_v9 }
  0xad   :  { %v561_v4 = vpop.eup %560  ;;  %506 = vmatprep.mubr.msk.f32.mxu0 %vm36_vm0, %v90_v0  ;;  %543 = vmatpush3.bf16.msra.mxu1 %v540_v8 }
  0xae   :  { %v563_v1 = vpop.eup %562  ;;  %v92_v2 = vmul.f32 %v561_v4, %v643_v16  ;;  %545 = vmatprep.subr.bf16.mxu1 %v544_v11 }
  0xaf   :  { %v93_v5 = vmul.f32 %v563_v1, %v648_v17 }
  0xb0   :  { %507 = vmatmul.mubr.msk.f32.gmra.mrb[4].mxu0 %vm36_vm0, %v91_v3 }
  0xb1   :  { %509 = vmatprep.mubr.msk.f32.mxu0 %vm36_vm0, %v92_v2  ;;  %547 = vmatpush3.bf16.msra.mxu1 %v544_v11 }
  0xb4   :  { %510 = vmatmul.mubr.msk.f32.gmra.mrb[6].mxu0 %vm36_vm0, %v93_v5 }
 0x17b   :  { %v502_v13 = vpop.f32.mrb[0].mxu0 }
 0x17c   :  { %v201_v14 = vadd.f32 %v502_v13, %v450_v12  ;;  %v195_v15 = vpop.f32.mrb[1].mxu0 }
 0x17d   :  { %v196_v16 = vadd.f32 %v450_v12, %v195_v15 }
 0x17e   :  { %vm235_vm1 = vcmp.ge.f32.partialorder %v201_v14, 0.0  ;;  %v243_v17 = vmul.f32 0.2, %v201_v14 }
 0x17f   :  { %v242_v18 = vmul.f32 0.2, %v196_v16  ;;  %v505_v19 = vpop.f32.mrb[2].mxu0  ;;  %vm234_vm2 = vcmp.ge.f32.partialorder %v196_v16, 0.0 }
 0x180   :  { %v251_v20 = vsel %vm235_vm1, %v201_v14, %v243_v17  ;;  %v211_v21 = vadd.f32 %v505_v19, %v450_v12  ;;  %v205_v22 = vpop.f32.mrb[3].mxu0 }
 0x181   :  { %v206_v23 = vadd.f32 %v450_v12, %v205_v22  ;;  %v250_v24 = vsel %vm234_vm2, %v196_v16, %v242_v18  ;;  %v259_v27 = vmul.f32 1.4142135, %v251_v20 }
 0x182   :  { %vm237_vm3 = vcmp.ge.f32.partialorder %v211_v21, 0.0  ;;  %v245_v25 = vmul.f32 0.2, %v211_v21  ;;  %v258_v26 = vmul.f32 1.4142135, %v250_v24 }
 0x183   :  { %vm236_vm4 = vcmp.ge.f32.partialorder %v206_v23, 0.0  ;;  %v244_v28 = vmul.f32 0.2, %v206_v23  ;;  %v508_v29 = vpop.f32.mrb[4].mxu0 }
 0x184   :  { %v253_v30 = vsel %vm237_vm3, %v211_v21, %v245_v25  ;;  %v221_v31 = vadd.f32 %v508_v29, %v450_v12  ;;  %v215_v32 = vpop.f32.mrb[5].mxu0  ;;  %520 = vmatprep.mubr.msk.f32.mxu1 %vm36_vm0, %v258_v26 }
 0x185   :  { %v252_v33 = vsel %vm236_vm4, %v206_v23, %v244_v28  ;;  %v216_v34 = vadd.f32 %v450_v12, %v215_v32  ;;  %521 = vmatmul.mubr.msk.f32.vlgmr.msra.gmra.mrb[0].mxu1 %vm36_vm0, %v259_v27  ;;  %v261_v37 = vmul.f32 1.4142135, %v253_v30 }
 0x186   :  { %v260_v35 = vmul.f32 1.4142135, %v252_v33  ;;  %vm239_vm5 = vcmp.ge.f32.partialorder %v221_v31, 0.0  ;;  %v247_v36 = vmul.f32 0.2, %v221_v31 }
 0x187   :  { %vm238_vm6 = vcmp.ge.f32.partialorder %v216_v34, 0.0  ;;  %v246_v38 = vmul.f32 0.2, %v216_v34  ;;  %v511_v39 = vpop.f32.mrb[6].mxu0 }
 0x188   :  { %v255_v40 = vsel %vm239_vm5, %v221_v31, %v247_v36  ;;  %v231_v41 = vadd.f32 %v511_v39, %v450_v12  ;;  %v225_v42 = vpop.f32.mrb[7].mxu0  ;;  %523 = vmatprep.mubr.msk.f32.mxu1 %vm36_vm0, %v260_v35 }
 0x189   :  { %v254_v43 = vsel %vm238_vm6, %v216_v34, %v246_v38  ;;  %v226_v44 = vadd.f32 %v450_v12, %v225_v42  ;;  %524 = vmatmul.mubr.msk.f32.gmra.mrb[2].mxu1 %vm36_vm0, %v261_v37  ;;  %v263_v47 = vmul.f32 1.4142135, %v255_v40 }
 0x18a   :  { %v262_v45 = vmul.f32 1.4142135, %v254_v43  ;;  %vm241_vm7 = vcmp.ge.f32.partialorder %v231_v41, 0.0  ;;  %v249_v46 = vmul.f32 0.2, %v231_v41 }
 0x18b   :  { %vm240_vm8 = vcmp.ge.f32.partialorder %v226_v44, 0.0  ;;  %v248_v48 = vmul.f32 0.2, %v226_v44 }
 0x18c   :  { %v257_v49 = vsel %vm241_vm7, %v231_v41, %v249_v46  ;;  %526 = vmatprep.mubr.msk.f32.mxu1 %vm36_vm0, %v262_v45 }
 0x18d   :  { %v256_v50 = vsel %vm240_vm8, %v226_v44, %v248_v48  ;;  %527 = vmatmul.mubr.msk.f32.gmra.mrb[4].mxu1 %vm36_vm0, %v263_v47  ;;  %v265_v52 = vmul.f32 1.4142135, %v257_v49 }
 0x18e   :  { %v264_v51 = vmul.f32 1.4142135, %v256_v50 }
 0x190   :  { %529 = vmatprep.mubr.msk.f32.mxu1 %vm36_vm0, %v264_v51 }
 0x191   :  { %530 = vmatmul.mubr.msk.f32.gmra.mrb[6].mxu1 %vm36_vm0, %v265_v52 }
 0x258   :  { %v522_v54 = vpop.f32.mrb[0].mxu1 }
 0x259   :  { %v373_v55 = vadd.f32 %v522_v54, %v459_v53  ;;  %v367_v56 = vpop.f32.mrb[1].mxu1 }
 0x25a   :  { %v368_v57 = vadd.f32 %v459_v53, %v367_v56 }
 0x25b   :  { %vm407_vm9 = vcmp.ge.f32.partialorder %v373_v55, 0.0  ;;  %v415_v58 = vmul.f32 0.2, %v373_v55 }
 0x25c   :  { %vm406_vm10 = vcmp.ge.f32.partialorder %v368_v57, 0.0  ;;  %v414_v59 = vmul.f32 0.2, %v368_v57  ;;  %v525_v60 = vpop.f32.mrb[2].mxu1 }
 0x25d   :  { %v423_v61 = vsel %vm407_vm9, %v373_v55, %v415_v58  ;;  %v383_v62 = vadd.f32 %v525_v60, %v459_v53  ;;  %v377_v63 = vpop.f32.mrb[3].mxu1 }
 0x25e   :  { %v431_v0 = vmul.f32 1.4142135, %v423_v61  ;;  %v422_v3 = vsel %vm406_vm10, %v368_v57, %v414_v59  ;;  %v378_v4 = vadd.f32 %v459_v53, %v377_v63 }
 0x25f   :  { %v430_v1 = vmul.f32 1.4142135, %v422_v3  ;;  %vm409_vm11 = vcmp.ge.f32.partialorder %v383_v62, 0.0  ;;  %v417_v2 = vmul.f32 0.2, %v383_v62 }
 0x260   :  { %439 = vst.msk [vmem:[%s749_s5 + $0x8] sm:$0xff] %vm36_vm0, %v431_v0  ;;  %vm408_vm12 = vcmp.ge.f32.partialorder %v378_v4, 0.0  ;;  %v416_v5 = vmul.f32 0.2, %v378_v4  ;;  %v528_v6 = vpop.f32.mrb[4].mxu1 }
 0x261   :  { %438 = vst.msk [vmem:[%s749_s5] sm:$0xff] %vm36_vm0, %v430_v1  ;;  %v425_v7 = vsel %vm409_vm11, %v383_v62, %v417_v2  ;;  %v393_v8 = vadd.f32 %v528_v6, %v459_v53  ;;  %v387_v9 = vpop.f32.mrb[5].mxu1 }
 0x262   :  { %v433_v10 = vmul.f32 1.4142135, %v425_v7  ;;  %v424_v11 = vsel %vm408_vm12, %v378_v4, %v416_v5  ;;  %v388_v12 = vadd.f32 %v459_v53, %v387_v9 }
 0x263   :  { %v432_v13 = vmul.f32 1.4142135, %v424_v11  ;;  %vm411_vm13 = vcmp.ge.f32.partialorder %v393_v8, 0.0  ;;  %v419_v14 = vmul.f32 0.2, %v393_v8 }
 0x264   :  { %441 = vst.msk [vmem:[%s749_s5 + $0x18] sm:$0xff] %vm36_vm0, %v433_v10  ;;  %vm410_vm14 = vcmp.ge.f32.partialorder %v388_v12, 0.0  ;;  %v418_v15 = vmul.f32 0.2, %v388_v12  ;;  %v531_v16 = vpop.f32.mrb[6].mxu1 }
 0x265   :  { %440 = vst.msk [vmem:[%s749_s5 + $0x10] sm:$0xff] %vm36_vm0, %v432_v13  ;;  %v427_v17 = vsel %vm411_vm13, %v393_v8, %v419_v14  ;;  %v403_v18 = vadd.f32 %v531_v16, %v459_v53  ;;  %v397_v19 = vpop.f32.mrb[7].mxu1 }
 0x266   :  { %v435_v20 = vmul.f32 1.4142135, %v427_v17  ;;  %v426_v21 = vsel %vm410_vm14, %v388_v12, %v418_v15  ;;  %v398_v22 = vadd.f32 %v459_v53, %v397_v19 }
 0x267   :  { %v434_v23 = vmul.f32 1.4142135, %v426_v21  ;;  %vm413_vm15 = vcmp.ge.f32.partialorder %v403_v18, 0.0  ;;  %v421_v24 = vmul.f32 0.2, %v403_v18 }
 0x268   :  { %443 = vst.msk [vmem:[%s749_s5 + $0x28] sm:$0xff] %vm36_vm0, %v435_v20  ;;  %vm412_vm1 = vcmp.ge.f32.partialorder %v398_v22, 0.0  ;;  %v420_v25 = vmul.f32 0.2, %v398_v22 }
 0x269   :  { %442 = vst.msk [vmem:[%s749_s5 + $0x20] sm:$0xff] %vm36_vm0, %v434_v23  ;;  %v429_v26 = vsel %vm413_vm15, %v403_v18, %v421_v24 }
 0x26a   :  { %v437_v27 = vmul.f32 1.4142135, %v429_v26  ;;  %v428_v28 = vsel %vm412_vm1, %v398_v22, %v420_v25 }
 0x26b   :  { %v436_v29 = vmul.f32 1.4142135, %v428_v28 }
 0x26c   :  { %445 = vst.msk [vmem:[%s749_s5 + $0x38] sm:$0xff] %vm36_vm0, %v437_v27 }
 0x26d   :  { %444 = vst.msk [vmem:[%s749_s5 + $0x30] sm:$0xff] %vm36_vm0, %v436_v29 }

</bundles_post_ra>
